<compile_context>
chip_gen: v7x
topology: tpu7x:2x2x1
jax: 0.10.0
libtpu: 0.0.40
codegen_flags: <defaults>
</compile_context>

<pallas_src>
import functools

import jax
import jax.numpy as jnp
from jax.experimental import pallas as pl
from jax.experimental.pallas import tpu as pltpu

# ---- config (small, synthetic, mirrors cfg.* in the reference module) -------
N_EMB = 8            # cfg.n_emb
DIM_MASK_EMB = 16    # cfg.dim_mask_emb
INPUT_CH_UV = 42     # input_ch_uv
HIDDEN_W = 32        # W (kept small per instructions)
D_IN = DIM_MASK_EMB + INPUT_CH_UV   # 58
D_UV_PAD = 48        # uv feature dim padded up to a multiple of 8 sublanes


def masknet_kernel(uvT_ref, ids_ref,
                   w1T_ref, embcT_ref, b1T_ref,
                   w2T_ref, b2T_ref,
                   w3T_ref, b3T_ref,
                   w4T_ref, b4T_ref,
                   w5T_ref, b5_ref,
                   o_ref):
    """One point-tile of MaskNet, transposed layout: (features, points)."""
    cdt = w1T_ref.dtype                 # MXU input dtype (f32 or bf16)
    tn = ids_ref.shape[1]               # points in this tile (lane axis)

    # Layer 1, uv part: (W, 48) @ (48, TN) -> (W, TN), lane-dense MXU output.
    h = jnp.dot(w1T_ref[...], uvT_ref[...], preferred_element_type=jnp.float32)

    # Layer 1, embedding part: one-hot(emb_id) matmul with (emb_table @ W1_emb)^T.
    onehot = (jax.lax.broadcasted_iota(jnp.int32, (N_EMB, tn), 0)
              == ids_ref[...]).astype(cdt)                        # (N_EMB, TN)
    h = h + jnp.dot(embcT_ref[...], onehot, preferred_element_type=jnp.float32)
    h = jnp.maximum(h + b1T_ref[...], 0.0)

    # Layers 2-4: (W, W) @ (W, TN) + ReLU (activations kept in f32).
    h = jnp.maximum(jnp.dot(w2T_ref[...], h.astype(cdt),
                            preferred_element_type=jnp.float32) + b2T_ref[...], 0.0)
    h = jnp.maximum(jnp.dot(w3T_ref[...], h.astype(cdt),
                            preferred_element_type=jnp.float32) + b3T_ref[...], 0.0)
    h = jnp.maximum(jnp.dot(w4T_ref[...], h.astype(cdt),
                            preferred_element_type=jnp.float32) + b4T_ref[...], 0.0)

    # Layer 5 + sigmoid: (1, W) @ (W, TN) -> lane-dense (1, TN) output row.
    logit = jnp.dot(w5T_ref[...], h.astype(cdt),
                    preferred_element_type=jnp.float32) + b5_ref[...]
    o_ref[...] = jax.nn.sigmoid(logit)


@functools.partial(jax.jit, static_argnames=("tile_n", "compute_dtype"))
def masknet_forward(uv, emb_id, params, emb_table, *,
                    tile_n=512, compute_dtype=jnp.float32):
    """Full MaskNet forward. uv: (N, 42) f32, emb_id: (N,) int32 -> (N, 1) f32."""
    n = uv.shape[0]
    n_pad = -(-n // tile_n) * tile_n
    pad_n = n_pad - n

    (w1, b1), (w2, b2), (w3, b3), (w4, b4), (w5, b5) = params

    # Split W1 into uv / embedding parts; fold the embedding table into W1.
    w1_uv = w1[:INPUT_CH_UV]                                     # (42, W)
    w1_emb = w1[INPUT_CH_UV:]                                    # (16, W)
    emb_c_t = (emb_table @ w1_emb).T.astype(compute_dtype)       # (W, N_EMB)

    # Pre-transposed / padded operands (tiny one-off XLA work, fused under jit).
    uv_t = jnp.pad(uv, ((0, pad_n), (0, D_UV_PAD - INPUT_CH_UV))
                   ).T.astype(compute_dtype)                     # (48, n_pad)
    ids2d = jnp.pad(emb_id.astype(jnp.int32), ((0, pad_n),)).reshape(1, n_pad)
    w1_t = jnp.pad(w1_uv, ((0, D_UV_PAD - INPUT_CH_UV), (0, 0))
                   ).T.astype(compute_dtype)                     # (W, 48)
    w2_t = w2.T.astype(compute_dtype)
    w3_t = w3.T.astype(compute_dtype)
    w4_t = w4.T.astype(compute_dtype)
    w5_t = w5.T.astype(compute_dtype)                            # (1, W)
    b1_t, b2_t, b3_t, b4_t = b1.T, b2.T, b3.T, b4.T              # (W, 1) f32
    b5_ = b5                                                     # (1, 1) f32

    full = lambda a: pl.BlockSpec(a.shape, lambda i: (0, 0))

    out = pl.pallas_call(
        masknet_kernel,
        out_shape=jax.ShapeDtypeStruct((1, n_pad), jnp.float32),
        grid_spec=pltpu.PrefetchScalarGridSpec(
            num_scalar_prefetch=0,
            grid=(n_pad // tile_n,),
            in_specs=[
                pl.BlockSpec((D_UV_PAD, tile_n), lambda i: (0, i)),  # uv^T tile
                pl.BlockSpec((1, tile_n), lambda i: (0, i)),         # emb ids
                full(w1_t), full(emb_c_t), full(b1_t),
                full(w2_t), full(b2_t),
                full(w3_t), full(b3_t),
                full(w4_t), full(b4_t),
                full(w5_t), full(b5_),
            ],
            out_specs=pl.BlockSpec((1, tile_n), lambda i: (0, i)),
        ),
        compiler_params=pltpu.CompilerParams(
            dimension_semantics=("parallel",)),    # shards tiles across v7x TCs
    )(uv_t, ids2d,
      w1_t, emb_c_t, b1_t,
      w2_t, b2_t, w3_t, b3_t, w4_t, b4_t,
      w5_t, b5_)

    return out[0, :n].reshape(n, 1)


def init_params(key):
    """Deterministic synthetic parameters matching the module's shapes."""
    dims = [(D_IN, HIDDEN_W), (HIDDEN_W, HIDDEN_W), (HIDDEN_W, HIDDEN_W),
            (HIDDEN_W, HIDDEN_W), (HIDDEN_W, 1)]
    keys = jax.random.split(key, 2 * len(dims) + 1)
    params = []
    for li, (din, dout) in enumerate(dims):
        kw, kb = keys[2 * li], keys[2 * li + 1]
        scale = 1.0 / jnp.sqrt(jnp.float32(din))
        w = jax.random.uniform(kw, (din, dout), jnp.float32, -scale, scale)
        b = jax.random.uniform(kb, (1, dout), jnp.float32, -scale, scale)
        params.append((w, b))
    emb_table = jax.random.normal(keys[-1], (N_EMB, DIM_MASK_EMB), jnp.float32)
    return params, emb_table


def masknet_reference(uv, emb_id, params, emb_table):
    """Pure-JAX reference mirroring the PyTorch module exactly."""
    emb = jnp.take(emb_table, emb_id, axis=0)
    h = jnp.concatenate([uv, emb], axis=-1)
    for li, (w, b) in enumerate(params):
        h = h @ w + b
        if li < len(params) - 1:
            h = jnp.maximum(h, 0.0)
    return jax.nn.sigmoid(h)


if __name__ == "__main__":
    key = jax.random.PRNGKey(0)
    k_uv, k_id, k_par = jax.random.split(key, 3)

    N = 1000   # deliberately not a multiple of tile_n: exercises padding path
    uv = jax.random.normal(k_uv, (N, INPUT_CH_UV), jnp.float32)
    emb_id = jax.random.randint(k_id, (N,), 0, N_EMB, jnp.int32)
    params, emb_table = init_params(k_par)

    ref = masknet_reference(uv, emb_id, params, emb_table)

    # f32 MXU path (default; v5e-friendly), tight check.
    mask = masknet_forward(uv, emb_id, params, emb_table, tile_n=512)
    mask = jax.block_until_ready(mask)
    assert mask.shape == (N, 1)
    assert jnp.allclose(mask, ref, atol=1e-4, rtol=1e-4), \
        float(jnp.max(jnp.abs(mask - ref)))

    # bf16 MXU-input path (v6e/v7x fast path; f32 accumulation), loose check.
    mask_bf16 = masknet_forward(uv, emb_id, params, emb_table,
                                tile_n=512, compute_dtype=jnp.bfloat16)
    mask_bf16 = jax.block_until_ready(mask_bf16)
    assert jnp.allclose(mask_bf16, ref, atol=2e-2, rtol=2e-2), \
        float(jnp.max(jnp.abs(mask_bf16 - ref)))

    print("KERNEL_OK")
</pallas_src>

<mosaic_0001>
module attributes {stable_mosaic.version = 11 : i64} {
  func.func @masknet_kernel(%arg0: i32, %arg1: memref<48x512xf32, #tpu.memory_space<vmem>>, %arg2: memref<1x512xi32, #tpu.memory_space<vmem>>, %arg3: memref<32x48xf32, #tpu.memory_space<vmem>>, %arg4: memref<32x8xf32, #tpu.memory_space<vmem>>, %arg5: memref<32x1xf32, #tpu.memory_space<vmem>>, %arg6: memref<32x32xf32, #tpu.memory_space<vmem>>, %arg7: memref<32x1xf32, #tpu.memory_space<vmem>>, %arg8: memref<32x32xf32, #tpu.memory_space<vmem>>, %arg9: memref<32x1xf32, #tpu.memory_space<vmem>>, %arg10: memref<32x32xf32, #tpu.memory_space<vmem>>, %arg11: memref<32x1xf32, #tpu.memory_space<vmem>>, %arg12: memref<1x32xf32, #tpu.memory_space<vmem>>, %arg13: memref<1x1xf32, #tpu.memory_space<vmem>>, %arg14: memref<1x512xf32, #tpu.memory_space<vmem>>) attributes {dimension_semantics = [#tpu.dimension_semantics<parallel>], iteration_bounds = array<i64: 2>, scalar_prefetch = 0 : i64, scratch_operands = 0 : i64, tpu.core_type = #tpu.core_type<tc>, window_params = [{transform_indices = @transform_0, window_bounds = array<i64: 48, 512>}, {transform_indices = @transform_1, window_bounds = array<i64: 1, 512>}, {pipeline_mode = #tpu.pipeline_mode<synchronous>, transform_indices = @transform_2, window_bounds = array<i64: 32, 48>}, {pipeline_mode = #tpu.pipeline_mode<synchronous>, transform_indices = @transform_3, window_bounds = array<i64: 32, 8>}, {pipeline_mode = #tpu.pipeline_mode<synchronous>, transform_indices = @transform_4, window_bounds = array<i64: 32, 1>}, {pipeline_mode = #tpu.pipeline_mode<synchronous>, transform_indices = @transform_5, window_bounds = array<i64: 32, 32>}, {pipeline_mode = #tpu.pipeline_mode<synchronous>, transform_indices = @transform_6, window_bounds = array<i64: 32, 1>}, {pipeline_mode = #tpu.pipeline_mode<synchronous>, transform_indices = @transform_7, window_bounds = array<i64: 32, 32>}, {pipeline_mode = #tpu.pipeline_mode<synchronous>, transform_indices = @transform_8, window_bounds = array<i64: 32, 1>}, {pipeline_mode = #tpu.pipeline_mode<synchronous>, transform_indices = @transform_9, window_bounds = array<i64: 32, 32>}, {pipeline_mode = #tpu.pipeline_mode<synchronous>, transform_indices = @transform_10, window_bounds = array<i64: 32, 1>}, {pipeline_mode = #tpu.pipeline_mode<synchronous>, transform_indices = @transform_11, window_bounds = array<i64: 1, 32>}, {pipeline_mode = #tpu.pipeline_mode<synchronous>, transform_indices = @transform_12, window_bounds = array<i64: 1, 1>}, {transform_indices = @transform_13, window_bounds = array<i64: 1, 512>}]} {
    %c0 = arith.constant 0 : index
    %c0_0 = arith.constant 0 : index
    %0 = vector.load %arg3[%c0, %c0_0] : memref<32x48xf32, #tpu.memory_space<vmem>>, vector<32x48xf32>
    %c0_1 = arith.constant 0 : index
    %c0_2 = arith.constant 0 : index
    %1 = vector.load %arg1[%c0_1, %c0_2] : memref<48x512xf32, #tpu.memory_space<vmem>>, vector<48x512xf32>
    %cst = arith.constant dense<0.000000e+00> : vector<32x512xf32>
    %2 = tpu.matmul %0, %1, %cst {dimension_numbers = #tpu.dot_dimension_numbers<[1], [0], [0], [1], [0, 0, 1, 1], [], []>} : vector<32x48xf32>, vector<48x512xf32>, vector<32x512xf32> -> vector<32x512xf32>
    %3 = tpu.iota {dimensions = array<i32: 0>} : vector<8x512xi32>
    %c0_3 = arith.constant 0 : index
    %c0_4 = arith.constant 0 : index
    %4 = vector.load %arg2[%c0_3, %c0_4] : memref<1x512xi32, #tpu.memory_space<vmem>>, vector<1x512xi32>
    %5 = vector.broadcast %4 : vector<1x512xi32> to vector<8x512xi32>
    %6 = arith.cmpi eq, %3, %5 : vector<8x512xi32>
    %7 = arith.extui %6 : vector<8x512xi1> to vector<8x512xi32>
    %8 = arith.sitofp %7 : vector<8x512xi32> to vector<8x512xf32>
    %c0_5 = arith.constant 0 : index
    %c0_6 = arith.constant 0 : index
    %9 = vector.load %arg4[%c0_5, %c0_6] : memref<32x8xf32, #tpu.memory_space<vmem>>, vector<32x8xf32>
    %cst_7 = arith.constant dense<0.000000e+00> : vector<32x512xf32>
    %10 = tpu.matmul %9, %8, %cst_7 {dimension_numbers = #tpu.dot_dimension_numbers<[1], [0], [0], [1], [0, 0, 1, 1], [], []>} : vector<32x8xf32>, vector<8x512xf32>, vector<32x512xf32> -> vector<32x512xf32>
    %11 = arith.addf %2, %10 : vector<32x512xf32>
    %c0_8 = arith.constant 0 : index
    %c0_9 = arith.constant 0 : index
    %12 = vector.load %arg5[%c0_8, %c0_9] : memref<32x1xf32, #tpu.memory_space<vmem>>, vector<32x1xf32>
    %13 = vector.broadcast %12 : vector<32x1xf32> to vector<32x512xf32>
    %14 = arith.addf %11, %13 : vector<32x512xf32>
    %cst_10 = arith.constant 0.000000e+00 : f32
    %15 = vector.broadcast %cst_10 : f32 to vector<32x512xf32>
    %16 = arith.maximumf %14, %15 : vector<32x512xf32>
    %c0_11 = arith.constant 0 : index
    %c0_12 = arith.constant 0 : index
    %17 = vector.load %arg6[%c0_11, %c0_12] : memref<32x32xf32, #tpu.memory_space<vmem>>, vector<32x32xf32>
    %cst_13 = arith.constant dense<0.000000e+00> : vector<32x512xf32>
    %18 = tpu.matmul %17, %16, %cst_13 {dimension_numbers = #tpu.dot_dimension_numbers<[1], [0], [0], [1], [0, 0, 1, 1], [], []>} : vector<32x32xf32>, vector<32x512xf32>, vector<32x512xf32> -> vector<32x512xf32>
    %c0_14 = arith.constant 0 : index
    %c0_15 = arith.constant 0 : index
    %19 = vector.load %arg7[%c0_14, %c0_15] : memref<32x1xf32, #tpu.memory_space<vmem>>, vector<32x1xf32>
    %20 = vector.broadcast %19 : vector<32x1xf32> to vector<32x512xf32>
    %21 = arith.addf %18, %20 : vector<32x512xf32>
    %cst_16 = arith.constant 0.000000e+00 : f32
    %22 = vector.broadcast %cst_16 : f32 to vector<32x512xf32>
    %23 = arith.maximumf %21, %22 : vector<32x512xf32>
    %c0_17 = arith.constant 0 : index
    %c0_18 = arith.constant 0 : index
    %24 = vector.load %arg8[%c0_17, %c0_18] : memref<32x32xf32, #tpu.memory_space<vmem>>, vector<32x32xf32>
    %cst_19 = arith.constant dense<0.000000e+00> : vector<32x512xf32>
    %25 = tpu.matmul %24, %23, %cst_19 {dimension_numbers = #tpu.dot_dimension_numbers<[1], [0], [0], [1], [0, 0, 1, 1], [], []>} : vector<32x32xf32>, vector<32x512xf32>, vector<32x512xf32> -> vector<32x512xf32>
    %c0_20 = arith.constant 0 : index
    %c0_21 = arith.constant 0 : index
    %26 = vector.load %arg9[%c0_20, %c0_21] : memref<32x1xf32, #tpu.memory_space<vmem>>, vector<32x1xf32>
    %27 = vector.broadcast %26 : vector<32x1xf32> to vector<32x512xf32>
    %28 = arith.addf %25, %27 : vector<32x512xf32>
    %cst_22 = arith.constant 0.000000e+00 : f32
    %29 = vector.broadcast %cst_22 : f32 to vector<32x512xf32>
    %30 = arith.maximumf %28, %29 : vector<32x512xf32>
    %c0_23 = arith.constant 0 : index
    %c0_24 = arith.constant 0 : index
    %31 = vector.load %arg10[%c0_23, %c0_24] : memref<32x32xf32, #tpu.memory_space<vmem>>, vector<32x32xf32>
    %cst_25 = arith.constant dense<0.000000e+00> : vector<32x512xf32>
    %32 = tpu.matmul %31, %30, %cst_25 {dimension_numbers = #tpu.dot_dimension_numbers<[1], [0], [0], [1], [0, 0, 1, 1], [], []>} : vector<32x32xf32>, vector<32x512xf32>, vector<32x512xf32> -> vector<32x512xf32>
    %c0_26 = arith.constant 0 : index
    %c0_27 = arith.constant 0 : index
    %33 = vector.load %arg11[%c0_26, %c0_27] : memref<32x1xf32, #tpu.memory_space<vmem>>, vector<32x1xf32>
    %34 = vector.broadcast %33 : vector<32x1xf32> to vector<32x512xf32>
    %35 = arith.addf %32, %34 : vector<32x512xf32>
    %cst_28 = arith.constant 0.000000e+00 : f32
    %36 = vector.broadcast %cst_28 : f32 to vector<32x512xf32>
    %37 = arith.maximumf %35, %36 : vector<32x512xf32>
    %c0_29 = arith.constant 0 : index
    %c0_30 = arith.constant 0 : index
    %38 = vector.load %arg12[%c0_29, %c0_30] : memref<1x32xf32, #tpu.memory_space<vmem>>, vector<1x32xf32>
    %cst_31 = arith.constant dense<0.000000e+00> : vector<1x512xf32>
    %39 = tpu.matmul %38, %37, %cst_31 {dimension_numbers = #tpu.dot_dimension_numbers<[1], [0], [0], [1], [0, 0, 1, 1], [], []>} : vector<1x32xf32>, vector<32x512xf32>, vector<1x512xf32> -> vector<1x512xf32>
    %c0_32 = arith.constant 0 : index
    %c0_33 = arith.constant 0 : index
    %40 = vector.load %arg13[%c0_32, %c0_33] : memref<1x1xf32, #tpu.memory_space<vmem>>, vector<1x1xf32>
    %41 = vector.broadcast %40 : vector<1x1xf32> to vector<1x512xf32>
    %42 = arith.addf %39, %41 : vector<1x512xf32>
    %43 = arith.negf %42 : vector<1x512xf32>
    %44 = math.exp %43 : vector<1x512xf32>
    %cst_34 = arith.constant 1.000000e+00 : f32
    %45 = vector.broadcast %cst_34 : f32 to vector<1x512xf32>
    %46 = arith.addf %45, %44 : vector<1x512xf32>
    %47 = arith.divf %45, %46 : vector<1x512xf32>
    %c0_35 = arith.constant 0 : index
    %c0_36 = arith.constant 0 : index
    %48 = vector.load %arg14[%c0_35, %c0_36] : memref<1x512xf32, #tpu.memory_space<vmem>>, vector<1x512xf32>
    tpu.vector_store %arg14[%c0_35, %c0_36], %47 {strides = array<i32>} : memref<1x512xf32, #tpu.memory_space<vmem>>, vector<1x512xf32>,
    return
  }
  func.func @transform_0(%arg0: i32) -> (i32, i32) {
    %c0_i32 = arith.constant 0 : i32
    %c0_i32_0 = arith.constant 0 : i32
    return %c0_i32, %arg0 : i32, i32
  }
  func.func @transform_1(%arg0: i32) -> (i32, i32) {
    %c0_i32 = arith.constant 0 : i32
    %c0_i32_0 = arith.constant 0 : i32
    return %c0_i32, %arg0 : i32, i32
  }
  func.func @transform_2(%arg0: i32) -> (i32, i32) {
    %c0_i32 = arith.constant 0 : i32
    %c0_i32_0 = arith.constant 0 : i32
    %c0_i32_1 = arith.constant 0 : i32
    return %c0_i32, %c0_i32_0 : i32, i32
  }
  func.func @transform_3(%arg0: i32) -> (i32, i32) {
    %c0_i32 = arith.constant 0 : i32
    %c0_i32_0 = arith.constant 0 : i32
    %c0_i32_1 = arith.constant 0 : i32
    return %c0_i32, %c0_i32_0 : i32, i32
  }
  func.func @transform_4(%arg0: i32) -> (i32, i32) {
    %c0_i32 = arith.constant 0 : i32
    %c0_i32_0 = arith.constant 0 : i32
    %c0_i32_1 = arith.constant 0 : i32
    return %c0_i32, %c0_i32_0 : i32, i32
  }
  func.func @transform_5(%arg0: i32) -> (i32, i32) {
    %c0_i32 = arith.constant 0 : i32
    %c0_i32_0 = arith.constant 0 : i32
    %c0_i32_1 = arith.constant 0 : i32
    return %c0_i32, %c0_i32_0 : i32, i32
  }
  func.func @transform_6(%arg0: i32) -> (i32, i32) {
    %c0_i32 = arith.constant 0 : i32
    %c0_i32_0 = arith.constant 0 : i32
    %c0_i32_1 = arith.constant 0 : i32
    return %c0_i32, %c0_i32_0 : i32, i32
  }
  func.func @transform_7(%arg0: i32) -> (i32, i32) {
    %c0_i32 = arith.constant 0 : i32
    %c0_i32_0 = arith.constant 0 : i32
    %c0_i32_1 = arith.constant 0 : i32
    return %c0_i32, %c0_i32_0 : i32, i32
  }
  func.func @transform_8(%arg0: i32) -> (i32, i32) {
    %c0_i32 = arith.constant 0 : i32
    %c0_i32_0 = arith.constant 0 : i32
    %c0_i32_1 = arith.constant 0 : i32
    return %c0_i32, %c0_i32_0 : i32, i32
  }
  func.func @transform_9(%arg0: i32) -> (i32, i32) {
    %c0_i32 = arith.constant 0 : i32
    %c0_i32_0 = arith.constant 0 : i32
    %c0_i32_1 = arith.constant 0 : i32
    return %c0_i32, %c0_i32_0 : i32, i32
  }
  func.func @transform_10(%arg0: i32) -> (i32, i32) {
    %c0_i32 = arith.constant 0 : i32
    %c0_i32_0 = arith.constant 0 : i32
    %c0_i32_1 = arith.constant 0 : i32
    return %c0_i32, %c0_i32_0 : i32, i32
  }
  func.func @transform_11(%arg0: i32) -> (i32, i32) {
    %c0_i32 = arith.constant 0 : i32
    %c0_i32_0 = arith.constant 0 : i32
    %c0_i32_1 = arith.constant 0 : i32
    return %c0_i32, %c0_i32_0 : i32, i32
  }
  func.func @transform_12(%arg0: i32) -> (i32, i32) {
    %c0_i32 = arith.constant 0 : i32
    %c0_i32_0 = arith.constant 0 : i32
    %c0_i32_1 = arith.constant 0 : i32
    return %c0_i32, %c0_i32_0 : i32, i32
  }
  func.func @transform_13(%arg0: i32) -> (i32, i32) {
    %c0_i32 = arith.constant 0 : i32
    %c0_i32_0 = arith.constant 0 : i32
    return %c0_i32, %arg0 : i32, i32
  }
}

</mosaic_0001>

<bundles_post_ra>
// kernel: masknet_forward.1
= control target key start
LH: loop header
LB: loop body
LE: loop exit
PB: predicated region body
PF: predicated region fallthrough
CT: control target
= control target key end

     0   :  { %s2679_s0 = inlined_call_operand.vmem [shape: f32[48,1024], index: 0, kind: input, shape index: {}]   ;;  %s2680_s1 = inlined_call_operand.vmem [shape: s32[1,1024], index: 1, kind: input, shape index: {}]   ;;  %s2681_s2 = inlined_call_operand.vmem [shape: f32[32,48], index: 2, kind: input, shape index: {}]   ;;  %s2682_s3 = inlined_call_operand.vmem [shape: f32[32,8], index: 3, kind: input, shape index: {}]   ;;  %s2683_s4 = inlined_call_operand.vmem [shape: f32[32,1], index: 4, kind: input, shape index: {}]   ;;  %s2684_s5 = inlined_call_operand.vmem [shape: f32[32,32], index: 5, kind: input, shape index: {}]   ;;  %s2685_s6 = inlined_call_operand.vmem [shape: f32[32,1], index: 6, kind: input, shape index: {}]   ;;  %s2686_s7 = inlined_call_operand.vmem [shape: f32[32,32], index: 7, kind: input, shape index: {}]   ;;  %s2687_s8 = inlined_call_operand.vmem [shape: f32[32,1], index: 8, kind: input, shape index: {}]   ;;  %s2688_s9 = inlined_call_operand.vmem [shape: f32[32,32], index: 9, kind: input, shape index: {}]   ;;  %s2689_s10 = inlined_call_operand.vmem [shape: f32[32,1], index: 10, kind: input, shape index: {}]   ;;  %s2690_s11 = inlined_call_operand.vmem [shape: f32[1,32], index: 11, kind: input, shape index: {}]   ;;  %s2691_s12 = inlined_call_operand.<no memory space> [shape: f32[1,1], index: 12, kind: input, shape index: {}]   ;;  %s2692_s13 = inlined_call_operand.vmem [shape: f32[1,1024], index: 13, kind: output, shape index: {}]  }
   0x1   :  { %v18_v0 = vstv %s2691_s12 }
   0x2   :  { %19 = vst [vmem:[#allocation2] sm:$0x1] %v18_v0 }
   0x3   :  { %s2330_s27 = smov 0   ;;  %s2332_s28 = smov 0  }
   0x4   :  { %s2334_s29 = smov 0  }
   0x5 LB: > { %s2011_s12 = sadd.s32 4294967295, %s2251_s29   ;;  %s2347_s30 = sadd.s32 1, %s2251_s29   ;;  %s2251_s29 = sphi %s2334_s29, %s2695_s29   ;;  %s2247_s28 = sphi %s2332_s28, %s2694_s28   ;;  %s2243_s27 = sphi %s2330_s27, %s2693_s27  }
   0x6   : > { %s29_s14 = ssub.s32 %s2251_s29, %s2347_s30  ;;  %s32_s15 = sadd.s32 1, %s2247_s28 }
   0x7   : > { %p30_p0 = scmp.eq.s32.totalorder %s29_s14, 0  ;;  %p39_p1 = scmp.ne.s32.totalorder %s2247_s28, %s2243_s27 }
   0x8   : > { %p40_p2 = scmp.eq.s32.totalorder %s2251_s29, 0  ;;  %p2014_p4 = scmp.ge.s32.totalorder %s2251_s29, 2 }
   0x9   : > { %s2356_s16 = scalar_select %p30_p0, %s2247_s28, %s32_s15  }
   0xa   : > { %p41_p3 = por %p40_p2, %p39_p1  ;;  %381 = sbr.rel (%p2014_p4) target bundleno = 34 (0x22), region = 60 }
  0x11   : > { %384 = sbr.rel (!%p41_p3) target bundleno = 34 (0x22), region = 64  ;;  %s386_s17 = sand.u32 (%p41_p3), 1, %s2247_s28  }
  0x12   : > { %s2076_s18 = sshll.u32 (%p41_p3), %s2251_s29, 5  ;;  %s2181_s19 = smul.u32 (%p41_p3), 192, %s386_s17 }
  0x13   : > { %s2364_s22 = scalar_lea.vmem (%p41_p3), %s2679_s0, %s2076_s18 }
  0x14   : > { %v404_v1 = vld [vmem:[%s2364_s22] sm:$0xff] (%p41_p3)  ;;  %v406_v2 = vld [vmem:[%s2364_s22 + $0x8] sm:$0xff] (%p41_p3)  ;;  %v408_v3 = vld [vmem:[%s2364_s22 + $0x10] sm:$0xff] (%p41_p3)  ;;  %s2372_s23 = scalar_lea.vmem (%p41_p3), [#allocation3], %s2181_s19 }
  0x15   : > { %v410_v4 = vld [vmem:[%s2364_s22 + $0x18] sm:$0xff] (%p41_p3)  ;;  %v412_v5 = vld [vmem:[%s2364_s22 + $0x40] sm:$0xff] (%p41_p3)  ;;  %v414_v6 = vld [vmem:[%s2364_s22 + $0x48] sm:$0xff] (%p41_p3)  ;;  %405 = vst [vmem:[%s2372_s23] sm:$0xff] (%p41_p3), %v404_v1 }
  0x16   : > { %407 = vst [vmem:[%s2372_s23 + $0x8] sm:$0xff] (%p41_p3), %v406_v2  ;;  %409 = vst [vmem:[%s2372_s23 + $0x10] sm:$0xff] (%p41_p3), %v408_v3  ;;  %v416_v7 = vld [vmem:[%s2364_s22 + $0x50] sm:$0xff] (%p41_p3)  ;;  %v418_v8 = vld [vmem:[%s2364_s22 + $0x58] sm:$0xff] (%p41_p3) }
  0x17   : > { %411 = vst [vmem:[%s2372_s23 + $0x18] sm:$0xff] (%p41_p3), %v410_v4  ;;  %413 = vst [vmem:[%s2372_s23 + $0x20] sm:$0xff] (%p41_p3), %v412_v5  ;;  %v420_v9 = vld [vmem:[%s2364_s22 + $0x80] sm:$0xff] (%p41_p3)  ;;  %v422_v10 = vld [vmem:[%s2364_s22 + $0x88] sm:$0xff] (%p41_p3) }
  0x18   : > { %415 = vst [vmem:[%s2372_s23 + $0x28] sm:$0xff] %v414_v6  ;;  %417 = vst [vmem:[%s2372_s23 + $0x30] sm:$0xff] %v416_v7  ;;  %v424_v11 = vld [vmem:[%s2364_s22 + $0x90] sm:$0xff]  ;;  %v426_v12 = vld [vmem:[%s2364_s22 + $0x98] sm:$0xff] }
  0x19   : > { %419 = vst [vmem:[%s2372_s23 + $0x38] sm:$0xff] %v418_v8  ;;  %421 = vst [vmem:[%s2372_s23 + $0x40] sm:$0xff] %v420_v9  ;;  %v428_v13 = vld [vmem:[%s2364_s22 + $0xc0] sm:$0xff]  ;;  %v430_v14 = vld [vmem:[%s2364_s22 + $0xc8] sm:$0xff] }
  0x1a   : > { %423 = vst [vmem:[%s2372_s23 + $0x48] sm:$0xff] %v422_v10  ;;  %425 = vst [vmem:[%s2372_s23 + $0x50] sm:$0xff] %v424_v11  ;;  %v432_v15 = vld [vmem:[%s2364_s22 + $0xd0] sm:$0xff]  ;;  %v434_v16 = vld [vmem:[%s2364_s22 + $0xd8] sm:$0xff] }
  0x1b   : > { %427 = vst [vmem:[%s2372_s23 + $0x58] sm:$0xff] %v426_v12  ;;  %429 = vst [vmem:[%s2372_s23 + $0x60] sm:$0xff] %v428_v13  ;;  %v436_v17 = vld [vmem:[%s2364_s22 + $0x100] sm:$0xff]  ;;  %v438_v18 = vld [vmem:[%s2364_s22 + $0x108] sm:$0xff] }
  0x1c   : > { %431 = vst [vmem:[%s2372_s23 + $0x68] sm:$0xff] %v430_v14  ;;  %433 = vst [vmem:[%s2372_s23 + $0x70] sm:$0xff] %v432_v15  ;;  %v440_v19 = vld [vmem:[%s2364_s22 + $0x110] sm:$0xff]  ;;  %v442_v20 = vld [vmem:[%s2364_s22 + $0x118] sm:$0xff] }
  0x1d   : > { %435 = vst [vmem:[%s2372_s23 + $0x78] sm:$0xff] %v434_v16  ;;  %437 = vst [vmem:[%s2372_s23 + $0x80] sm:$0xff] %v436_v17  ;;  %v444_v21 = vld [vmem:[%s2364_s22 + $0x140] sm:$0xff]  ;;  %v446_v22 = vld [vmem:[%s2364_s22 + $0x148] sm:$0xff] }
  0x1e   : > { %439 = vst [vmem:[%s2372_s23 + $0x88] sm:$0xff] %v438_v18  ;;  %441 = vst [vmem:[%s2372_s23 + $0x90] sm:$0xff] %v440_v19  ;;  %v448_v23 = vld [vmem:[%s2364_s22 + $0x150] sm:$0xff]  ;;  %v450_v24 = vld [vmem:[%s2364_s22 + $0x158] sm:$0xff] }
  0x1f   : > { %443 = vst [vmem:[%s2372_s23 + $0x98] sm:$0xff] %v442_v20  ;;  %445 = vst [vmem:[%s2372_s23 + $0xa0] sm:$0xff] %v444_v21 }
  0x20   : > { %447 = vst [vmem:[%s2372_s23 + $0xa8] sm:$0xff] %v446_v22  ;;  %449 = vst [vmem:[%s2372_s23 + $0xb0] sm:$0xff] %v448_v23 }
  0x21   : > { %451 = vst [vmem:[%s2372_s23 + $0xb8] sm:$0xff] %v450_v24 }
  0x22 PF: > { %p2017_p5 = scmp.ge.s32.totalorder %s2251_s29, 1  ;;  %p464_p6 = scmp.lt.s32.totalorder %s2251_s29, 3 }
  0x24   : > { %p465_p7 = pnand %p2017_p5, %p464_p6 }
  0x25   : > { %s2018_s24 = sshll.u32 (!%p465_p7), %s2011_s12, 2  ;;  %v556_v25 = vlaneseq (!%p465_p7)  ;;  %v2253_v26 = vmov (!%p465_p7), 0.0   ;;  %s471_s25 = sand.u32 (!%p465_p7), 1, %s2243_s27   ;;  %v2254_v28 = vmov (!%p465_p7), 0   ;;  %v973_v29 = vld [vmem:[%s2683_s4] sm:$0xff] (!%p465_p7)  ;;  %v975_v34 = vld [vmem:[%s2683_s4 + $0x10] sm:$0xff] (!%p465_p7) }
  0x26   : > { %468 = sbr.rel (%p465_p7) target bundleno = 1261 (0x4ed), region = 91  ;;  %p519_p8 = scmp.lt.s32.totalorder (!%p465_p7), %s2018_s24, 7  ;;  %668 = vmatprep.mubr.f32.mxu0 (!%p465_p7), %v2253_v26  ;;  %757 = vmatprep.mubr.f32.mxu1 (!%p465_p7), %v2253_v26  ;;  %v974_v35 = vld [vmem:[%s2683_s4 + $0x8] sm:$0xff] (!%p465_p7)  ;;  %vm591_vm0 = vcmask (!%p465_p7), 64512   ;;  %v587_v49 = vld [vmem:[%s2682_s3] sm:$0xff] (!%p465_p7)  ;;  %v2255_v50 = vmov (!%p465_p7), 1.0  }
  0x27   : > { %v2424_v27 = vshrl.u32 (!%p465_p7), %v556_v25, 7  ;;  %s2182_s26 = smul.u32 (!%p465_p7), 192, %s471_s25  ;;  %2211 = vset.pattern.permute.xlu0 (!%p465_p7), %v2254_v28  ;;  %2212 = vset.pattern.permute.xlu1 (!%p465_p7), %v2254_v28  ;;  %v588_v63 = vld [vmem:[%s2682_s3 + $0x8] sm:$0xff] (!%p465_p7)  ;;  %v589_v12 = vld [vmem:[%s2682_s3 + $0x10] sm:$0xff] (!%p465_p7)  ;;  %v590_v17 = vld [vmem:[%s2682_s3 + $0x18] sm:$0xff] (!%p465_p7)  ;;  %vm782_vm5 = vcmask (!%p465_p7), 392192  }
  0x28   : > { %979 = vperm.xlu0 (!%p465_p7), %2211, %v973_v29   ;;  %989 = vperm.xlu1 (!%p465_p7), %2212, %v975_v34   ;;  %v1033_v18 = vld [vmem:[%s2685_s6] sm:$0xff] (!%p465_p7)  ;;  %v976_v19 = vld [vmem:[%s2683_s4 + $0x18] sm:$0xff] (!%p465_p7)  ;;  %v1035_v21 = vld [vmem:[%s2685_s6 + $0x10] sm:$0xff] (!%p465_p7)  ;;  %vm1057_vm6 = vcmask (!%p465_p7), 261120   ;;  %vm1943_vm7 = vcmp.lt.s32.totalorder (!%p465_p7), %v556_v25, 512 }
  0x29   : > { %v565_v30 = vsub.s32 (!%p465_p7), 1, %v2424_v27  ;;  %v573_v31 = vsub.s32 (!%p465_p7), 3, %v2424_v27  ;;  %v561_v32 = vsub.s32 (!%p465_p7), 0, %v2424_v27  ;;  %v569_v33 = vsub.s32 (!%p465_p7), 2, %v2424_v27  ;;  %s2445_s21 = scalar_lea.vmem (!%p465_p7), [#allocation3], %s2182_s26  ;;  %v528_v20 = vld [vmem:[%s2681_s2] sm:$0xff] (!%p465_p7) }
  0x2a   : > { %v533_v37 = vld [vmem:[%s2445_s21 + $0x8] sm:$0xff] (!%p465_p7)  ;;  %v535_v43 = vld [vmem:[%s2445_s21 + $0x18] sm:$0xff] (!%p465_p7)  ;;  %v532_v45 = vld [vmem:[%s2445_s21] sm:$0xff] (!%p465_p7) }
  0x2b   : > { %v537_v38 = vld [vmem:[%s2445_s21 + $0x28] sm:$0xff] (!%p465_p7)  ;;  %v539_v44 = vld [vmem:[%s2445_s21 + $0x38] sm:$0xff] (!%p465_p7)  ;;  %v536_v46 = vld [vmem:[%s2445_s21 + $0x20] sm:$0xff] (!%p465_p7) }
  0x2c   : > { %v534_v47 = vld [vmem:[%s2445_s21 + $0x10] sm:$0xff] (!%p465_p7)  ;;  %984 = vperm.xlu0 (!%p465_p7), %2211, %v974_v35   ;;  %v2077_v51 = vpack.c.bf16 (!%p465_p7), %v537_v38, %v533_v37  ;;  %v2089_v52 = vpack.c.bf16 (!%p465_p7), %v539_v44, %v535_v43  ;;  %v541_v53 = vld [vmem:[%s2445_s21 + $0x48] sm:$0xff] (!%p465_p7)  ;;  %v2079_v55 = vpack.c.bf16 (!%p465_p7), %v536_v46, %v532_v45  ;;  %v543_v57 = vld [vmem:[%s2445_s21 + $0x58] sm:$0xff] (!%p465_p7)  ;;  %994 = vperm.xlu1 (!%p465_p7), %2212, %v976_v19  }
  0x2d   : > { %s2697_s24 = smov (!%p519_p8, %s2018_s24), 7  ;;  %v538_v48 = vld [vmem:[%s2445_s21 + $0x30] sm:$0xff]  ;;  %v545_v54 = vld [vmem:[%s2445_s21 + $0x68] sm:$0xff]  ;;  %v547_v58 = vld [vmem:[%s2445_s21 + $0x78] sm:$0xff] }
  0x2e   : > { %s521_s18 = scalar_lea.vmem %s2680_s1, %s2697_s24  ;;  %v2091_v56 = vpack.c.bf16 %v538_v48, %v534_v47  ;;  %v540_v59 = vld [vmem:[%s2445_s21 + $0x40] sm:$0xff]  ;;  %v542_v61 = vld [vmem:[%s2445_s21 + $0x50] sm:$0xff]  ;;  %v2081_v0 = vpack.c.bf16 %v545_v54, %v541_v53  ;;  %v2093_v1 = vpack.c.bf16 %v547_v58, %v543_v57  ;;  %v549_v2 = vld [vmem:[%s2445_s21 + $0x88] sm:$0xff]  ;;  %s526_s22 = scalar_lea.vmem %s2692_s13, %s2697_s24 }
  0x2f   : > { %v558_v36 = vld [vmem:[%s521_s18] sm:$0xf]  ;;  %v546_v62 = vld [vmem:[%s2445_s21 + $0x70] sm:$0xff]  ;;  %v553_v3 = vld [vmem:[%s2445_s21 + $0xa8] sm:$0xff] }
  0x30   : > { %v566_v39 = vrot.slane %v558_v36, %v565_v30  ;;  %v574_v40 = vrot.slane %v558_v36, %v573_v31  ;;  %v562_v41 = vrot.slane %v558_v36, %v561_v32  ;;  %v570_v42 = vrot.slane %v558_v36, %v569_v33  ;;  %v544_v60 = vld [vmem:[%s2445_s21 + $0x60] sm:$0xff]  ;;  %v551_v6 = vld [vmem:[%s2445_s21 + $0x98] sm:$0xff]  ;;  %v550_v10 = vld [vmem:[%s2445_s21 + $0x90] sm:$0xff]  ;;  %1039 = vperm.xlu0 %2211, %v1033_v18  }
  0x31   : > { %v2083_v4 = vpack.c.bf16 %v544_v60, %v540_v59  ;;  %v2095_v5 = vpack.c.bf16 %v546_v62, %v542_v61  ;;  %v555_v7 = vld [vmem:[%s2445_s21 + $0xb8] sm:$0xff]  ;;  %v548_v8 = vld [vmem:[%s2445_s21 + $0x80] sm:$0xff]  ;;  %v554_v11 = vld [vmem:[%s2445_s21 + $0xb0] sm:$0xff]  ;;  %v2085_v13 = vpack.c.bf16 %v553_v3, %v549_v2 }
  0x32   : > { %vm576_vm1 = vcmp.eq.s32.totalorder %v2424_v27, %v566_v39  ;;  %vm578_vm2 = vcmp.eq.s32.totalorder %v2424_v27, %v574_v40  ;;  %vm575_vm3 = vcmp.eq.s32.totalorder %v2424_v27, %v562_v41  ;;  %vm577_vm4 = vcmp.eq.s32.totalorder %v2424_v27, %v570_v42  ;;  %v552_v9 = vld [vmem:[%s2445_s21 + $0xa0] sm:$0xff]  ;;  %v1036_v28 = vld [vmem:[%s2685_s6 + $0x18] sm:$0xff]  ;;  %v530_v29 = vld [vmem:[%s2681_s2 + $0x10] sm:$0xff] }
  0x33   : > { %2024 = vmatprep.subr.msk.mxu0 %vm576_vm1, %v2255_v50  ;;  %2030 = vmatprep.subr.msk.mxu1 %vm578_vm2, %v2255_v50  ;;  %v2097_v14 = vpack.c.bf16 %v555_v7, %v551_v6  ;;  %v2087_v15 = vpack.c.bf16 %v552_v9, %v548_v8  ;;  %v2099_v16 = vpack.c.bf16 %v554_v11, %v550_v10  ;;  %v1034_v22 = vld [vmem:[%s2685_s6 + $0x8] sm:$0xff]  ;;  %v1268_v24 = vld [vmem:[%s2687_s8] sm:$0xff]  ;;  %v1270_v30 = vld [vmem:[%s2687_s8 + $0x10] sm:$0xff] }
  0x34   : > { %2025 = vmatpush1.msk.msra.mxu0 %vm575_vm3, %v2255_v50  ;;  %2031 = vmatpush1.msk.msra.mxu1 %vm577_vm4, %v2255_v50  ;;  %v529_v23 = vld [vmem:[%s2681_s2 + $0x8] sm:$0xff]  ;;  %v531_v33 = vld [vmem:[%s2681_s2 + $0x18] sm:$0xff]  ;;  %v1502_v34 = vld [vmem:[%s2689_s10] sm:$0xff] }
  0x35   : > { %2026 = vmatmul.mubr.msk.f32.vlgmr.msra.gmra.mrb[0].mxu0 %vm591_vm0, %v587_v49  ;;  %2032 = vmatmul.mubr.msk.f32.vlgmr.msra.gmra.mrb[0].mxu1 %vm591_vm0, %v587_v49  ;;  %v1269_v31 = vld [vmem:[%s2687_s8 + $0x8] sm:$0xff]  ;;  %v1271_v35 = vld [vmem:[%s2687_s8 + $0x18] sm:$0xff]  ;;  %v1504_v36 = vld [vmem:[%s2689_s10 + $0x10] sm:$0xff] }
  0x36   : > { %674 = vmatprep.mubr.f32.mxu0 %v2253_v26  ;;  %763 = vmatprep.mubr.f32.mxu1 %v2253_v26  ;;  %v1503_v37 = vld [vmem:[%s2689_s10 + $0x8] sm:$0xff]  ;;  %v1733_v38 = vld [vmem:[#allocation2] sm:$0x1]  ;;  %v1505_v39 = vld [vmem:[%s2689_s10 + $0x18] sm:$0xff] }
  0x37   : > { %2078 = vmatprep.subr.bf16.mxu0 %v2077_v51  ;;  %2090 = vmatprep.subr.bf16.mxu1 %v2089_v52 }
  0x38   : > { %2080 = vmatpush1.bf16.msra.mxu0 %v2079_v55  ;;  %2092 = vmatpush1.bf16.msra.mxu1 %v2091_v56 }
  0x39   : > { %2027 = vmatmul.mubr.msk.f32.gmra.mrb[2].mxu0 %vm591_vm0, %v588_v63  ;;  %2033 = vmatmul.mubr.msk.f32.gmra.mrb[2].mxu1 %vm591_vm0, %v588_v63 }
  0x3a   : > { %680 = vmatprep.mubr.f32.mxu0 %v2253_v26  ;;  %769 = vmatprep.mubr.f32.mxu1 %v2253_v26 }
  0x3b   : > { %2082 = vmatprep.subr.bf16.mxu0 %v2081_v0  ;;  %2094 = vmatprep.subr.bf16.mxu1 %v2093_v1 }
  0x3c   : > { %2084 = vmatpush1.bf16.msra.mxu0 %v2083_v4  ;;  %2096 = vmatpush1.bf16.msra.mxu1 %v2095_v5 }
  0x3d   : > { %2028 = vmatmul.mubr.msk.f32.gmra.mrb[4].mxu0 %vm591_vm0, %v589_v12  ;;  %2034 = vmatmul.mubr.msk.f32.gmra.mrb[4].mxu1 %vm591_vm0, %v589_v12 }
  0x3e   : > { %686 = vmatprep.mubr.f32.mxu0 %v2253_v26  ;;  %775 = vmatprep.mubr.f32.mxu1 %v2253_v26 }
  0x3f   : > { %2086 = vmatprep.subr.bf16.mxu0 %v2085_v13  ;;  %2098 = vmatprep.subr.bf16.mxu1 %v2097_v14 }
  0x40   : > { %2088 = vmatpush1.bf16.msra.mxu0 %v2087_v15  ;;  %2100 = vmatpush1.bf16.msra.mxu1 %v2099_v16 }
  0x41   : > { %2029 = vmatmul.mubr.msk.f32.gmra.mrb[6].mxu0 %vm591_vm0, %v590_v17  ;;  %2035 = vmatmul.mubr.msk.f32.gmra.mrb[6].mxu1 %vm591_vm0, %v590_v17 }
  0x42   : > { %859 = vmatprep.mubr.f32.mxu0 %v2253_v26  ;;  %948 = vmatprep.mubr.f32.mxu1 %v2253_v26 }
  0x43   : > { %1049 = vperm.xlu0 %2211, %v1035_v21   ;;  %1044 = vperm.xlu1 %2212, %v1034_v22  }
  0x45   : > { %2036 = vmatmul.mubr.msk.f32.vlgmr.msra.gmra.mrb[0].mxu0 %vm782_vm5, %v528_v20  ;;  %2040 = vmatmul.mubr.msk.f32.vlgmr.msra.gmra.mrb[0].mxu1 %vm782_vm5, %v528_v20 }
  0x46   : > { %865 = vmatprep.mubr.f32.mxu0 %v2253_v26  ;;  %954 = vmatprep.mubr.f32.mxu1 %v2253_v26 }
  0x47   : > { %1274 = vperm.xlu0 %2211, %v1268_v24   ;;  %1054 = vperm.xlu1 %2212, %v1036_v28  }
  0x49   : > { %2037 = vmatmul.mubr.msk.f32.gmra.mrb[2].mxu0 %vm782_vm5, %v529_v23  ;;  %2041 = vmatmul.mubr.msk.f32.gmra.mrb[2].mxu1 %vm782_vm5, %v529_v23 }
  0x4a   : > { %871 = vmatprep.mubr.f32.mxu0 %v2253_v26  ;;  %960 = vmatprep.mubr.f32.mxu1 %v2253_v26 }
  0x4b   : > { %1284 = vperm.xlu0 %2211, %v1270_v30   ;;  %1279 = vperm.xlu1 %2212, %v1269_v31  }
  0x4d   : > { %2038 = vmatmul.mubr.msk.f32.gmra.mrb[4].mxu0 %vm782_vm5, %v530_v29  ;;  %2042 = vmatmul.mubr.msk.f32.gmra.mrb[4].mxu1 %vm782_vm5, %v530_v29 }
  0x4e   : > { %877 = vmatprep.mubr.f32.mxu0 %v2253_v26  ;;  %966 = vmatprep.mubr.f32.mxu1 %v2253_v26 }
  0x4f   : > { %1508 = vperm.xlu0 %2211, %v1502_v34   ;;  %1289 = vperm.xlu1 %2212, %v1271_v35  }
  0x51   : > { %2039 = vmatmul.mubr.msk.f32.gmra.mrb[6].mxu0 %vm782_vm5, %v531_v33  ;;  %2043 = vmatmul.mubr.msk.f32.gmra.mrb[6].mxu1 %vm782_vm5, %v531_v33 }
  0x52   : > { %1134 = vmatprep.mubr.f32.mxu0 %v2253_v26  ;;  %1223 = vmatprep.mubr.f32.mxu1 %v2253_v26 }
  0x53   : > { %1518 = vperm.xlu0 %2211, %v1504_v36   ;;  %1513 = vperm.xlu1 %2212, %v1503_v37  }
  0x57   : > { %1736 = vperm.xlu0 %2211, %v1733_v38   ;;  %1523 = vperm.xlu1 %2212, %v1505_v39  }
  0xa7   : > { %v980_v40 = vpop.permute.xlu0 %979  ;;  %v990_v46 = vpop.permute.xlu1 %989 }
  0xab   : > { %v985_v45 = vpop.permute.xlu0 %984  ;;  %v995_v11 = vpop.permute.xlu1 %994 }
 0x118   : > { %v861_v41 = vpop.f32.mrb[0].mxu0  ;;  %v950_v42 = vpop.f32.mrb[0].mxu1 }
 0x119   : > { %v863_v43 = vpop.f32.mrb[1].mxu0  ;;  %v952_v44 = vpop.f32.mrb[1].mxu1  ;;  %v997_v47 = vadd.f32 %v980_v40, %v861_v41  ;;  %v999_v48 = vadd.f32 %v980_v40, %v950_v42  ;;  %v1030_v41 = vld [vmem:[%s2684_s5 + $0x8] sm:$0xff]  ;;  %v1031_v42 = vld [vmem:[%s2684_s5 + $0x10] sm:$0xff] }
 0x11a   : > { %v998_v49 = vadd.f32 %v980_v40, %v863_v43  ;;  %v1000_v50 = vadd.f32 %v980_v40, %v952_v44  ;;  %v1029_v40 = vld [vmem:[%s2684_s5] sm:$0xff]  ;;  %v1032_v43 = vld [vmem:[%s2684_s5 + $0x18] sm:$0xff] }
 0x11b   : > { %v1013_v59 = vmax.f32 %v997_v47, 0.0  ;;  %v1015_v60 = vmax.f32 %v999_v48, 0.0  ;;  %v1040_v48 = vpop.permute.xlu0 %1039 }
 0x11c   : > { %v867_v51 = vpop.f32.mrb[2].mxu0  ;;  %v956_v52 = vpop.f32.mrb[2].mxu1  ;;  %v1014_v63 = vmax.f32 %v998_v49, 0.0  ;;  %v1016_v0 = vmax.f32 %v1000_v50, 0.0 }
 0x11d   : > { %v1001_v53 = vadd.f32 %v985_v45, %v867_v51  ;;  %v1003_v54 = vadd.f32 %v985_v45, %v956_v52  ;;  %v869_v55 = vpop.f32.mrb[3].mxu0  ;;  %v958_v56 = vpop.f32.mrb[3].mxu1 }
 0x11e   : > { %v1002_v57 = vadd.f32 %v985_v45, %v869_v55  ;;  %v1004_v58 = vadd.f32 %v985_v45, %v958_v56  ;;  %v1045_v49 = vpop.permute.xlu1 %1044 }
 0x11f   : > { %v1017_v61 = vmax.f32 %v1001_v53, 0.0  ;;  %v1019_v62 = vmax.f32 %v1003_v54, 0.0 }
 0x120   : > { %v1018_v1 = vmax.f32 %v1002_v57, 0.0  ;;  %v1020_v2 = vmax.f32 %v1004_v58, 0.0  ;;  %v873_v3 = vpop.f32.mrb[4].mxu0  ;;  %v962_v4 = vpop.f32.mrb[4].mxu1 }
 0x121   : > { %v2103_v5 = vpack.c.bf16 %v1017_v61, %v1013_v59  ;;  %v2111_v6 = vpack.c.bf16 %v1019_v62, %v1015_v60  ;;  %v875_v7 = vpop.f32.mrb[5].mxu0  ;;  %v964_v8 = vpop.f32.mrb[5].mxu1  ;;  %v1005_v12 = vadd.f32 %v990_v46, %v873_v3  ;;  %v1007_v13 = vadd.f32 %v990_v46, %v962_v4 }
 0x122   : > { %v2101_v9 = vpack.c.bf16 %v1018_v1, %v1014_v63  ;;  %v2109_v10 = vpack.c.bf16 %v1020_v2, %v1016_v0  ;;  %v1006_v14 = vadd.f32 %v990_v46, %v875_v7  ;;  %v1008_v15 = vadd.f32 %v990_v46, %v964_v8 }
 0x123   : > { %v1021_v24 = vmax.f32 %v1005_v12, 0.0  ;;  %v1023_v28 = vmax.f32 %v1007_v13, 0.0  ;;  %v1050_v12 = vpop.permute.xlu0 %1049 }
 0x124   : > { %v879_v16 = vpop.f32.mrb[6].mxu0  ;;  %v968_v17 = vpop.f32.mrb[6].mxu1  ;;  %2102 = vmatprep.subr.bf16.mxu0 %v2101_v9  ;;  %2110 = vmatprep.subr.bf16.mxu1 %v2109_v10  ;;  %v1022_v31 = vmax.f32 %v1006_v14, 0.0  ;;  %v1024_v33 = vmax.f32 %v1008_v15, 0.0 }
 0x125   : > { %v1009_v18 = vadd.f32 %v995_v11, %v879_v16  ;;  %v1011_v19 = vadd.f32 %v995_v11, %v968_v17  ;;  %v881_v20 = vpop.f32.mrb[7].mxu0  ;;  %v970_v21 = vpop.f32.mrb[7].mxu1  ;;  %2104 = vmatpush1.bf16.msra.mxu0 %v2103_v5  ;;  %2112 = vmatpush1.bf16.msra.mxu1 %v2111_v6 }
 0x126   : > { %v1010_v22 = vadd.f32 %v995_v11, %v881_v20  ;;  %v1012_v23 = vadd.f32 %v995_v11, %v970_v21  ;;  %v1055_v15 = vpop.permute.xlu1 %1054 }
 0x127   : > { %v1025_v29 = vmax.f32 %v1009_v18, 0.0  ;;  %v1027_v30 = vmax.f32 %v1011_v19, 0.0 }
 0x128   : > { %v1026_v34 = vmax.f32 %v1010_v22, 0.0  ;;  %v1028_v35 = vmax.f32 %v1012_v23, 0.0 }
 0x129   : > { %v2107_v36 = vpack.c.bf16 %v1025_v29, %v1021_v24  ;;  %v2115_v37 = vpack.c.bf16 %v1027_v30, %v1023_v28 }
 0x12a   : > { %v2105_v38 = vpack.c.bf16 %v1026_v34, %v1022_v31  ;;  %v2113_v39 = vpack.c.bf16 %v1028_v35, %v1024_v33 }
 0x12c   : > { %2106 = vmatprep.subr.bf16.mxu0 %v2105_v38  ;;  %2114 = vmatprep.subr.bf16.mxu1 %v2113_v39 }
 0x12d   : > { %2108 = vmatpush1.bf16.msra.mxu0 %v2107_v36  ;;  %2116 = vmatpush1.bf16.msra.mxu1 %v2115_v37 }
 0x130   : > { %2044 = vmatmul.mubr.msk.f32.vlgmr.msra.gmra.mrb[8].mxu0 %vm1057_vm6, %v1029_v40  ;;  %2048 = vmatmul.mubr.msk.f32.vlgmr.msra.gmra.mrb[8].mxu1 %vm1057_vm6, %v1029_v40 }
 0x131   : > { %1140 = vmatprep.mubr.f32.mxu0 %v2253_v26  ;;  %1229 = vmatprep.mubr.f32.mxu1 %v2253_v26 }
 0x134   : > { %2045 = vmatmul.mubr.msk.f32.gmra.mrb[10].mxu0 %vm1057_vm6, %v1030_v41  ;;  %2049 = vmatmul.mubr.msk.f32.gmra.mrb[10].mxu1 %vm1057_vm6, %v1030_v41 }
 0x135   : > { %1146 = vmatprep.mubr.f32.mxu0 %v2253_v26  ;;  %1235 = vmatprep.mubr.f32.mxu1 %v2253_v26 }
 0x138   : > { %2046 = vmatmul.mubr.msk.f32.gmra.mrb[12].mxu0 %vm1057_vm6, %v1031_v42  ;;  %2050 = vmatmul.mubr.msk.f32.gmra.mrb[12].mxu1 %vm1057_vm6, %v1031_v42 }
 0x139   : > { %1152 = vmatprep.mubr.f32.mxu0 %v2253_v26  ;;  %1241 = vmatprep.mubr.f32.mxu1 %v2253_v26 }
 0x13c   : > { %2047 = vmatmul.mubr.msk.f32.gmra.mrb[14].mxu0 %vm1057_vm6, %v1032_v43  ;;  %2051 = vmatmul.mubr.msk.f32.gmra.mrb[14].mxu1 %vm1057_vm6, %v1032_v43 }
 0x13d   : > { %1368 = vmatprep.mubr.f32.mxu0 %v2253_v26  ;;  %1457 = vmatprep.mubr.f32.mxu1 %v2253_v26 }
 0x203   : > { %v1136_v44 = vpop.f32.mrb[8].mxu0  ;;  %v1225_v45 = vpop.f32.mrb[8].mxu1 }
 0x204   : > { %v1138_v46 = vpop.f32.mrb[9].mxu0  ;;  %v1227_v47 = vpop.f32.mrb[9].mxu1  ;;  %v1137_v50 = vadd.f32 %v1136_v44, %v1040_v48  ;;  %v1226_v51 = vadd.f32 %v1225_v45, %v1040_v48  ;;  %v1264_v44 = vld [vmem:[%s2686_s7] sm:$0xff]  ;;  %v1265_v45 = vld [vmem:[%s2686_s7 + $0x8] sm:$0xff] }
 0x205   : > { %v1139_v52 = vadd.f32 %v1138_v46, %v1040_v48  ;;  %v1228_v53 = vadd.f32 %v1227_v47, %v1040_v48  ;;  %v1266_v46 = vld [vmem:[%s2686_s7 + $0x10] sm:$0xff]  ;;  %v1267_v47 = vld [vmem:[%s2686_s7 + $0x18] sm:$0xff] }
 0x206   : > { %v1248_v62 = vmax.f32 %v1137_v50, 0.0  ;;  %v1250_v63 = vmax.f32 %v1226_v51, 0.0 }
 0x207   : > { %v1142_v54 = vpop.f32.mrb[10].mxu0  ;;  %v1231_v55 = vpop.f32.mrb[10].mxu1  ;;  %v1249_v2 = vmax.f32 %v1139_v52, 0.0  ;;  %v1251_v3 = vmax.f32 %v1228_v53, 0.0 }
 0x208   : > { %v1143_v56 = vadd.f32 %v1142_v54, %v1045_v49  ;;  %v1232_v57 = vadd.f32 %v1231_v55, %v1045_v49  ;;  %v1144_v58 = vpop.f32.mrb[11].mxu0  ;;  %v1233_v59 = vpop.f32.mrb[11].mxu1 }
 0x209   : > { %v1145_v60 = vadd.f32 %v1144_v58, %v1045_v49  ;;  %v1234_v61 = vadd.f32 %v1233_v59, %v1045_v49  ;;  %v1275_v52 = vpop.permute.xlu0 %1274  ;;  %v1280_v53 = vpop.permute.xlu1 %1279 }
 0x20a   : > { %v1252_v0 = vmax.f32 %v1143_v56, 0.0  ;;  %v1254_v1 = vmax.f32 %v1232_v57, 0.0 }
 0x20b   : > { %v1253_v4 = vmax.f32 %v1145_v60, 0.0  ;;  %v1255_v5 = vmax.f32 %v1234_v61, 0.0  ;;  %v1148_v6 = vpop.f32.mrb[12].mxu0  ;;  %v1237_v7 = vpop.f32.mrb[12].mxu1 }
 0x20c   : > { %v2119_v8 = vpack.c.bf16 %v1252_v0, %v1248_v62  ;;  %v2127_v9 = vpack.c.bf16 %v1254_v1, %v1250_v63  ;;  %v1150_v10 = vpop.f32.mrb[13].mxu0  ;;  %v1239_v11 = vpop.f32.mrb[13].mxu1  ;;  %v1149_v16 = vadd.f32 %v1148_v6, %v1050_v12  ;;  %v1238_v17 = vadd.f32 %v1237_v7, %v1050_v12 }
 0x20d   : > { %v2117_v13 = vpack.c.bf16 %v1253_v4, %v1249_v2  ;;  %v2125_v14 = vpack.c.bf16 %v1255_v5, %v1251_v3  ;;  %v1151_v18 = vadd.f32 %v1150_v10, %v1050_v12  ;;  %v1240_v19 = vadd.f32 %v1239_v11, %v1050_v12 }
 0x20e   : > { %v1256_v31 = vmax.f32 %v1149_v16, 0.0  ;;  %v1258_v33 = vmax.f32 %v1238_v17, 0.0  ;;  %v1285_v16 = vpop.permute.xlu0 %1284 }
 0x20f   : > { %v1154_v20 = vpop.f32.mrb[14].mxu0  ;;  %v1243_v21 = vpop.f32.mrb[14].mxu1  ;;  %2118 = vmatprep.subr.bf16.mxu0 %v2117_v13  ;;  %2126 = vmatprep.subr.bf16.mxu1 %v2125_v14  ;;  %v1257_v36 = vmax.f32 %v1151_v18, 0.0  ;;  %v1259_v37 = vmax.f32 %v1240_v19, 0.0 }
 0x210   : > { %v1155_v22 = vadd.f32 %v1154_v20, %v1055_v15  ;;  %v1244_v23 = vadd.f32 %v1243_v21, %v1055_v15  ;;  %v1156_v24 = vpop.f32.mrb[15].mxu0  ;;  %v1245_v28 = vpop.f32.mrb[15].mxu1  ;;  %2120 = vmatpush1.bf16.msra.mxu0 %v2119_v8  ;;  %2128 = vmatpush1.bf16.msra.mxu1 %v2127_v9 }
 0x211   : > { %v1157_v29 = vadd.f32 %v1156_v24, %v1055_v15  ;;  %v1246_v30 = vadd.f32 %v1245_v28, %v1055_v15  ;;  %v1290_v19 = vpop.permute.xlu1 %1289 }
 0x212   : > { %v1260_v34 = vmax.f32 %v1155_v22, 0.0  ;;  %v1262_v35 = vmax.f32 %v1244_v23, 0.0 }
 0x213   : > { %v1261_v38 = vmax.f32 %v1157_v29, 0.0  ;;  %v1263_v39 = vmax.f32 %v1246_v30, 0.0 }
 0x214   : > { %v2123_v40 = vpack.c.bf16 %v1260_v34, %v1256_v31  ;;  %v2131_v41 = vpack.c.bf16 %v1262_v35, %v1258_v33 }
 0x215   : > { %v2121_v42 = vpack.c.bf16 %v1261_v38, %v1257_v36  ;;  %v2129_v43 = vpack.c.bf16 %v1263_v39, %v1259_v37 }
 0x217   : > { %2122 = vmatprep.subr.bf16.mxu0 %v2121_v42  ;;  %2130 = vmatprep.subr.bf16.mxu1 %v2129_v43 }
 0x218   : > { %2124 = vmatpush1.bf16.msra.mxu0 %v2123_v40  ;;  %2132 = vmatpush1.bf16.msra.mxu1 %v2131_v41 }
 0x21b   : > { %2052 = vmatmul.mubr.msk.f32.vlgmr.msra.gmra.mrb[16].mxu0 %vm1057_vm6, %v1264_v44  ;;  %2056 = vmatmul.mubr.msk.f32.vlgmr.msra.gmra.mrb[16].mxu1 %vm1057_vm6, %v1264_v44 }
 0x21c   : > { %1374 = vmatprep.mubr.f32.mxu0 %v2253_v26  ;;  %1463 = vmatprep.mubr.f32.mxu1 %v2253_v26 }
 0x21f   : > { %2053 = vmatmul.mubr.msk.f32.gmra.mrb[18].mxu0 %vm1057_vm6, %v1265_v45  ;;  %2057 = vmatmul.mubr.msk.f32.gmra.mrb[18].mxu1 %vm1057_vm6, %v1265_v45 }
 0x220   : > { %1380 = vmatprep.mubr.f32.mxu0 %v2253_v26  ;;  %1469 = vmatprep.mubr.f32.mxu1 %v2253_v26 }
 0x223   : > { %2054 = vmatmul.mubr.msk.f32.gmra.mrb[20].mxu0 %vm1057_vm6, %v1266_v46  ;;  %2058 = vmatmul.mubr.msk.f32.gmra.mrb[20].mxu1 %vm1057_vm6, %v1266_v46 }
 0x224   : > { %1386 = vmatprep.mubr.f32.mxu0 %v2253_v26  ;;  %1475 = vmatprep.mubr.f32.mxu1 %v2253_v26 }
 0x227   : > { %2055 = vmatmul.mubr.msk.f32.gmra.mrb[22].mxu0 %vm1057_vm6, %v1267_v47  ;;  %2059 = vmatmul.mubr.msk.f32.gmra.mrb[22].mxu1 %vm1057_vm6, %v1267_v47 }
 0x228   : > { %1602 = vmatprep.mubr.f32.mxu0 %v2253_v26  ;;  %1691 = vmatprep.mubr.f32.mxu1 %v2253_v26 }
 0x2ee   : > { %v1370_v48 = vpop.f32.mrb[16].mxu0  ;;  %v1459_v49 = vpop.f32.mrb[16].mxu1 }
 0x2ef   : > { %v1372_v50 = vpop.f32.mrb[17].mxu0  ;;  %v1461_v51 = vpop.f32.mrb[17].mxu1  ;;  %v1371_v54 = vadd.f32 %v1370_v48, %v1275_v52  ;;  %v1460_v55 = vadd.f32 %v1459_v49, %v1275_v52  ;;  %v1498_v48 = vld [vmem:[%s2688_s9] sm:$0xff]  ;;  %v1499_v49 = vld [vmem:[%s2688_s9 + $0x8] sm:$0xff] }
 0x2f0   : > { %v1373_v56 = vadd.f32 %v1372_v50, %v1275_v52  ;;  %v1462_v57 = vadd.f32 %v1461_v51, %v1275_v52  ;;  %v1500_v50 = vld [vmem:[%s2688_s9 + $0x10] sm:$0xff]  ;;  %v1501_v51 = vld [vmem:[%s2688_s9 + $0x18] sm:$0xff] }
 0x2f1   : > { %v1482_v2 = vmax.f32 %v1371_v54, 0.0  ;;  %v1484_v3 = vmax.f32 %v1460_v55, 0.0 }
 0x2f2   : > { %v1376_v58 = vpop.f32.mrb[18].mxu0  ;;  %v1465_v59 = vpop.f32.mrb[18].mxu1  ;;  %v1483_v6 = vmax.f32 %v1373_v56, 0.0  ;;  %v1485_v7 = vmax.f32 %v1462_v57, 0.0 }
 0x2f3   : > { %v1377_v60 = vadd.f32 %v1376_v58, %v1280_v53  ;;  %v1466_v61 = vadd.f32 %v1465_v59, %v1280_v53  ;;  %v1378_v62 = vpop.f32.mrb[19].mxu0  ;;  %v1467_v63 = vpop.f32.mrb[19].mxu1 }
 0x2f4   : > { %v1379_v0 = vadd.f32 %v1378_v62, %v1280_v53  ;;  %v1468_v1 = vadd.f32 %v1467_v63, %v1280_v53  ;;  %v1509_v56 = vpop.permute.xlu0 %1508  ;;  %v1514_v57 = vpop.permute.xlu1 %1513 }
 0x2f5   : > { %v1486_v4 = vmax.f32 %v1377_v60, 0.0  ;;  %v1488_v5 = vmax.f32 %v1466_v61, 0.0 }
 0x2f6   : > { %v1487_v8 = vmax.f32 %v1379_v0, 0.0  ;;  %v1489_v9 = vmax.f32 %v1468_v1, 0.0  ;;  %v1382_v10 = vpop.f32.mrb[20].mxu0  ;;  %v1471_v11 = vpop.f32.mrb[20].mxu1 }
 0x2f7   : > { %v2135_v12 = vpack.c.bf16 %v1486_v4, %v1482_v2  ;;  %v2143_v13 = vpack.c.bf16 %v1488_v5, %v1484_v3  ;;  %v1384_v14 = vpop.f32.mrb[21].mxu0  ;;  %v1473_v15 = vpop.f32.mrb[21].mxu1  ;;  %v1383_v20 = vadd.f32 %v1382_v10, %v1285_v16  ;;  %v1472_v21 = vadd.f32 %v1471_v11, %v1285_v16 }
 0x2f8   : > { %v2133_v17 = vpack.c.bf16 %v1487_v8, %v1483_v6  ;;  %v2141_v18 = vpack.c.bf16 %v1489_v9, %v1485_v7  ;;  %v1385_v22 = vadd.f32 %v1384_v14, %v1285_v16  ;;  %v1474_v23 = vadd.f32 %v1473_v15, %v1285_v16 }
 0x2f9   : > { %v1490_v36 = vmax.f32 %v1383_v20, 0.0  ;;  %v1492_v37 = vmax.f32 %v1472_v21, 0.0 }
 0x2fa   : > { %v1388_v24 = vpop.f32.mrb[22].mxu0  ;;  %v1477_v28 = vpop.f32.mrb[22].mxu1  ;;  %2134 = vmatprep.subr.bf16.mxu0 %v2133_v17  ;;  %2142 = vmatprep.subr.bf16.mxu1 %v2141_v18  ;;  %v1491_v40 = vmax.f32 %v1385_v22, 0.0  ;;  %v1493_v41 = vmax.f32 %v1474_v23, 0.0 }
 0x2fb   : > { %v1389_v29 = vadd.f32 %v1388_v24, %v1290_v19  ;;  %v1478_v30 = vadd.f32 %v1477_v28, %v1290_v19  ;;  %v1390_v31 = vpop.f32.mrb[23].mxu0  ;;  %v1479_v33 = vpop.f32.mrb[23].mxu1  ;;  %2136 = vmatpush1.bf16.msra.mxu0 %v2135_v12  ;;  %2144 = vmatpush1.bf16.msra.mxu1 %v2143_v13 }
 0x2fc   : > { %v1391_v34 = vadd.f32 %v1390_v31, %v1290_v19  ;;  %v1480_v35 = vadd.f32 %v1479_v33, %v1290_v19  ;;  %v1519_v19 = vpop.permute.xlu0 %1518  ;;  %v1524_v22 = vpop.permute.xlu1 %1523 }
 0x2fd   : > { %v1494_v38 = vmax.f32 %v1389_v29, 0.0  ;;  %v1496_v39 = vmax.f32 %v1478_v30, 0.0 }
 0x2fe   : > { %v1495_v42 = vmax.f32 %v1391_v34, 0.0  ;;  %v1497_v43 = vmax.f32 %v1480_v35, 0.0 }
 0x2ff   : > { %v2139_v44 = vpack.c.bf16 %v1494_v38, %v1490_v36  ;;  %v2147_v45 = vpack.c.bf16 %v1496_v39, %v1492_v37 }
 0x300   : > { %v2137_v46 = vpack.c.bf16 %v1495_v42, %v1491_v40  ;;  %v2145_v47 = vpack.c.bf16 %v1497_v43, %v1493_v41 }
 0x302   : > { %2138 = vmatprep.subr.bf16.mxu0 %v2137_v46  ;;  %2146 = vmatprep.subr.bf16.mxu1 %v2145_v47 }
 0x303   : > { %2140 = vmatpush1.bf16.msra.mxu0 %v2139_v44  ;;  %2148 = vmatpush1.bf16.msra.mxu1 %v2147_v45 }
 0x306   : > { %2060 = vmatmul.mubr.msk.f32.vlgmr.msra.gmra.mrb[24].mxu0 %vm1057_vm6, %v1498_v48  ;;  %2064 = vmatmul.mubr.msk.f32.vlgmr.msra.gmra.mrb[24].mxu1 %vm1057_vm6, %v1498_v48 }
 0x307   : > { %1608 = vmatprep.mubr.f32.mxu0 %v2253_v26  ;;  %1697 = vmatprep.mubr.f32.mxu1 %v2253_v26 }
 0x30a   : > { %2061 = vmatmul.mubr.msk.f32.gmra.mrb[26].mxu0 %vm1057_vm6, %v1499_v49  ;;  %2065 = vmatmul.mubr.msk.f32.gmra.mrb[26].mxu1 %vm1057_vm6, %v1499_v49 }
 0x30b   : > { %1614 = vmatprep.mubr.f32.mxu0 %v2253_v26  ;;  %1703 = vmatprep.mubr.f32.mxu1 %v2253_v26 }
 0x30e   : > { %2062 = vmatmul.mubr.msk.f32.gmra.mrb[28].mxu0 %vm1057_vm6, %v1500_v50  ;;  %2066 = vmatmul.mubr.msk.f32.gmra.mrb[28].mxu1 %vm1057_vm6, %v1500_v50 }
 0x30f   : > { %1620 = vmatprep.mubr.f32.mxu0 %v2253_v26  ;;  %1709 = vmatprep.mubr.f32.mxu1 %v2253_v26 }
 0x312   : > { %2063 = vmatmul.mubr.msk.f32.gmra.mrb[30].mxu0 %vm1057_vm6, %v1501_v51  ;;  %2067 = vmatmul.mubr.msk.f32.gmra.mrb[30].mxu1 %vm1057_vm6, %v1501_v51  ;;  %v1732_v51 = vld [vmem:[%s2690_s11] sm:$0x1] }
 0x313   : > { %1810 = vmatprep.mubr.f32.mxu0 %v2253_v26  ;;  %1881 = vmatprep.mubr.f32.mxu1 %v2253_v26 }
 0x3d9   : > { %v1604_v52 = vpop.f32.mrb[24].mxu0  ;;  %v1693_v53 = vpop.f32.mrb[24].mxu1 }
 0x3da   : > { %v1606_v54 = vpop.f32.mrb[25].mxu0  ;;  %v1695_v55 = vpop.f32.mrb[25].mxu1  ;;  %v1605_v58 = vadd.f32 %v1604_v52, %v1509_v56  ;;  %v1694_v59 = vadd.f32 %v1693_v53, %v1509_v56 }
 0x3db   : > { %v1607_v60 = vadd.f32 %v1606_v54, %v1509_v56  ;;  %v1696_v61 = vadd.f32 %v1695_v55, %v1509_v56  ;;  %v1737_v52 = vpop.permute.xlu0 %1736 }
 0x3dc   : > { %v1716_v6 = vmax.f32 %v1605_v58, 0.0  ;;  %v1718_v26 = vmax.f32 %v1694_v59, 0.0  ;;  %v1742_v53 = vrot.slane %v1737_v52, %v561_v32 }
 0x3dd   : > { %v1610_v62 = vpop.f32.mrb[26].mxu0  ;;  %v1699_v63 = vpop.f32.mrb[26].mxu1  ;;  %v1717_v9 = vmax.f32 %v1607_v60, 0.0  ;;  %v1719_v10 = vmax.f32 %v1696_v61, 0.0 }
 0x3de   : > { %v1611_v0 = vadd.f32 %v1610_v62, %v1514_v57  ;;  %v1700_v1 = vadd.f32 %v1699_v63, %v1514_v57  ;;  %v1612_v2 = vpop.f32.mrb[27].mxu0  ;;  %v1701_v3 = vpop.f32.mrb[27].mxu1 }
 0x3df   : > { %v1613_v4 = vadd.f32 %v1612_v2, %v1514_v57  ;;  %v1702_v5 = vadd.f32 %v1701_v3, %v1514_v57 }
 0x3e0   : > { %v1720_v7 = vmax.f32 %v1611_v0, 0.0  ;;  %v1722_v8 = vmax.f32 %v1700_v1, 0.0 }
 0x3e1   : > { %v1721_v11 = vmax.f32 %v1613_v4, 0.0  ;;  %v1723_v12 = vmax.f32 %v1702_v5, 0.0  ;;  %v1616_v13 = vpop.f32.mrb[28].mxu0  ;;  %v1705_v14 = vpop.f32.mrb[28].mxu1 }
 0x3e2   : > { %v2151_v15 = vpack.c.bf16 %v1720_v7, %v1716_v6  ;;  %v2159_v16 = vpack.c.bf16 %v1722_v8, %v1718_v26  ;;  %v1618_v17 = vpop.f32.mrb[29].mxu0  ;;  %v1707_v18 = vpop.f32.mrb[29].mxu1  ;;  %v1617_v23 = vadd.f32 %v1616_v13, %v1519_v19  ;;  %v1706_v24 = vadd.f32 %v1705_v14, %v1519_v19 }
 0x3e3   : > { %v2149_v20 = vpack.c.bf16 %v1721_v11, %v1717_v9  ;;  %v2157_v21 = vpack.c.bf16 %v1723_v12, %v1719_v10  ;;  %v1619_v28 = vadd.f32 %v1618_v17, %v1519_v19  ;;  %v1708_v29 = vadd.f32 %v1707_v18, %v1519_v19 }
 0x3e4   : > { %v1724_v39 = vmax.f32 %v1617_v23, 0.0  ;;  %v1726_v40 = vmax.f32 %v1706_v24, 0.0  ;;  %v2256_v8 = vmov 1966171168  }
 0x3e5   : > { %v1622_v30 = vpop.f32.mrb[30].mxu0  ;;  %v1711_v31 = vpop.f32.mrb[30].mxu1  ;;  %2150 = vmatprep.subr.bf16.mxu0 %v2149_v20  ;;  %2158 = vmatprep.subr.bf16.mxu1 %v2157_v21  ;;  %v1725_v43 = vmax.f32 %v1619_v28, 0.0  ;;  %v1727_v44 = vmax.f32 %v1708_v29, 0.0  ;;  %v1919_v9 = vunpack.c.l.s4 %v2256_v8 }
 0x3e6   : > { %v1623_v33 = vadd.f32 %v1622_v30, %v1524_v22  ;;  %v1712_v34 = vadd.f32 %v1711_v31, %v1524_v22  ;;  %v1624_v35 = vpop.f32.mrb[31].mxu0  ;;  %v1713_v36 = vpop.f32.mrb[31].mxu1  ;;  %2152 = vmatpush1.bf16.msra.mxu0 %v2151_v15  ;;  %2160 = vmatpush1.bf16.msra.mxu1 %v2159_v16 }
 0x3e7   : > { %v1625_v37 = vadd.f32 %v1624_v35, %v1524_v22  ;;  %v1714_v38 = vadd.f32 %v1713_v36, %v1524_v22  ;;  %v1920_v10 = vunpack.c.0.s8 %v1919_v9 }
 0x3e8   : > { %v1728_v41 = vmax.f32 %v1623_v33, 0.0  ;;  %v1730_v42 = vmax.f32 %v1712_v34, 0.0 }
 0x3e9   : > { %v1729_v45 = vmax.f32 %v1625_v37, 0.0  ;;  %v1731_v46 = vmax.f32 %v1714_v38, 0.0  ;;  %v1923_v13 = vsub.s32 %v1920_v10, %v2424_v27 }
 0x3ea   : > { %v2155_v47 = vpack.c.bf16 %v1728_v41, %v1724_v39  ;;  %v2163_v48 = vpack.c.bf16 %v1730_v42, %v1726_v40 }
 0x3eb   : > { %v2153_v49 = vpack.c.bf16 %v1729_v45, %v1725_v43  ;;  %v2161_v50 = vpack.c.bf16 %v1731_v46, %v1727_v44 }
 0x3ed   : > { %2154 = vmatprep.subr.bf16.mxu0 %v2153_v49  ;;  %2162 = vmatprep.subr.bf16.mxu1 %v2161_v50 }
 0x3ee   : > { %2156 = vmatpush1.bf16.msra.mxu0 %v2155_v47  ;;  %2164 = vmatpush1.bf16.msra.mxu1 %v2163_v48 }
 0x3f1   : > { %2068 = vmatmul.mubr.msk.f32.vlgmr.msra.gmra.mrb[32].mxu0 %vm1057_vm6, %v1732_v51  ;;  %2069 = vmatmul.mubr.msk.f32.vlgmr.msra.gmra.mrb[32].mxu1 %vm1057_vm6, %v1732_v51 }
 0x4c4   : > { %v1812_v54 = vpop.f32.mrb[32].mxu0  ;;  %v1883_v55 = vpop.f32.mrb[32].mxu1 }
 0x4c5   : > { %v1813_v56 = vadd.f32 %v1812_v54, %v1742_v53  ;;  %v1884_v57 = vadd.f32 %v1883_v55, %v1742_v53  ;;  %v1814_v58 = vpop.f32.mrb[33].mxu0  ;;  %v1885_v59 = vpop.f32.mrb[33].mxu1 }
 0x4c6   : > { %v1815_v60 = vadd.f32 %v1814_v58, %v1742_v53  ;;  %v1886_v61 = vadd.f32 %v1885_v59, %v1742_v53 }
 0x4c7   : > { %v2070_v62 = vmul.f32 -1.442695, %v1813_v56  ;;  %v2072_v63 = vmul.f32 -1.442695, %v1884_v57 }
 0x4c8   : > { %v2071_v0 = vmul.f32 -1.442695, %v1815_v60  ;;  %v2073_v1 = vmul.f32 -1.442695, %v1886_v61 }
 0x4c9   : > { %2213 = vpow2.f32 %v2070_v62 }
 0x4ca   : > { %2215 = vpow2.f32 %v2072_v63 }
 0x4cb   : > { %2217 = vpow2.f32 %v2071_v0 }
 0x4cc   : > { %2219 = vpow2.f32 %v2073_v1 }
 0x4d3   : > { %v2214_v2 = vpop.eup %2213 }
 0x4d4   : > { %v2216_v3 = vpop.eup %2215  ;;  %v1900_v4 = vadd.f32 1.0, %v2214_v2 }
 0x4d5   : > { %v2218_v32 = vpop.eup %2217  ;;  %v1902_v5 = vadd.f32 1.0, %v2216_v3 }
 0x4d6   : > { %v2220_v6 = vpop.eup %2219  ;;  %2221 = vrcp.f32 %v1900_v4  ;;  %v1901_v26 = vadd.f32 1.0, %v2218_v32 }
 0x4d7   : > { %2223 = vrcp.f32 %v1902_v5  ;;  %v1903_v7 = vadd.f32 1.0, %v2220_v6 }
 0x4d8   : > { %2225 = vrcp.f32 %v1901_v26 }
 0x4d9   : > { %2227 = vrcp.f32 %v1903_v7 }
 0x4e0   : > { %v2222_v11 = vpop.eup %2221 }
 0x4e1   : > { %v2224_v12 = vpop.eup %2223 }
 0x4e2   : > { %v2226_v14 = vpop.eup %2225 }
 0x4e3   : > { %v2228_v15 = vpop.eup %2227  ;;  %v1916_v16 = vcombine.low %v2222_v11, %v2226_v14 }
 0x4e4   : > { %v1917_v17 = vcombine.low %v2224_v12, %v2228_v15 }
 0x4e5   : > { %v1924_v18 = vrot.slane %v1916_v16, %v1923_v13 }
 0x4e6   : > { %v1931_v19 = vrot.slane %v1917_v17, %v1923_v13 }
 0x4e8   : > { %v1932_v20 = vcombine.low %v1924_v18, %v1931_v19 }
 0x4ea   : > { %v1939_v21 = vrot.slane %v1932_v20, %v1923_v13 }
 0x4ec   : > { %1945 = vst.msk [vmem:[%s526_s22] sm:$0xf] %vm1943_vm7, %v1939_v21 }
 0x4ed PF: > { %p22_p9 = scmp.ge.s32.totalorder %s2347_s30, 4   ;;  %s2693_s27 = smov %s2247_s28 }
 0x4ee   : > { %s2694_s28 = smov %s2356_s16  ;;  %s2695_s29 = smov %s2347_s30 }
 0x4ef   :  { %24 = sbr.rel (!%p22_p9) target bundleno = 5 (0x5), region = 133 }

</bundles_post_ra>
